<compile_context>
chip_gen: v5e
topology: v5e:2x2
jax: 0.10.0
libtpu: 0.0.40
codegen_flags: <defaults>
</compile_context>

<pallas_src>
import functools

import jax
import jax.numpy as jnp
from jax.experimental import pallas as pl
from jax.experimental.pallas import tpu as pltpu

BN_EPS = 1e-5


# ---------------------------------------------------------------------------
# Kernel
# ---------------------------------------------------------------------------
def mc_kernel(x_ref, xg_ref, wa_ref, wb_ref, ba_ref, bb_ref,
              wo1_ref, wo2_ref, wo3_ref, bo_ref, out_ref, *, hp):
    """One row-tile of the MC forward pass.

    x_ref  : (tile_m, IN)      bf16
    wa_ref : (IN, 2*hp)        bf16   columns = [w1' | w3a']   (BN folded)
    wb_ref : (IN, 2*hp)        bf16   columns = [w2' | w3b']
    ba/bb  : (1, 2*hp)         f32    folded biases
    wo1/2/3: (hp, OUTp)        bf16   output projection split for h1 / h2 / d
    bo_ref : (1, OUTp)         f32    (-1e30 in padded lanes)
    out_ref: (tile_m, OUTp)    f32    log_softmax(logits)
    """
    # Hidden GEMMs (bf16 on the MXU, f32 accumulate), BN already folded in.
    ha = jnp.maximum(
        jnp.dot(x_ref[...], wa_ref[...], preferred_element_type=jnp.float32)
        + ba_ref[...],
        0.0,
    )  # (tile_m, 2*hp) = [h1 | h3a]
    hb = jnp.maximum(
        jnp.dot(xg_ref[...], wb_ref[...], preferred_element_type=jnp.float32)
        + bb_ref[...],
        0.0,
    )  # (tile_m, 2*hp) = [h2 | h3b]

    # Lane-aligned slices (hp is a multiple of 128 => free views).
    h1 = ha[:, :hp]
    h2 = hb[:, :hp]
    d = jnp.abs(ha[:, hp:] - hb[:, hp:])  # dropout is identity in eval mode

    # cat([h1, h2, d]) @ Wo + bo  ==  h1@Wo1 + h2@Wo2 + d@Wo3 + bo
    logits = (
        jnp.dot(h1.astype(jnp.bfloat16), wo1_ref[...],
                preferred_element_type=jnp.float32)
        + jnp.dot(h2.astype(jnp.bfloat16), wo2_ref[...],
                  preferred_element_type=jnp.float32)
        + jnp.dot(d.astype(jnp.bfloat16), wo3_ref[...],
                  preferred_element_type=jnp.float32)
        + bo_ref[...]
    )

    # log_softmax over the padded lane dim; padded lanes carry bias = -1e30 so
    # they contribute exp(...) == 0 and never win the max.
    mx = jnp.max(logits, axis=-1, keepdims=True)
    shifted = logits - mx
    lse = jnp.log(jnp.sum(jnp.exp(shifted), axis=-1, keepdims=True))
    out_ref[...] = (shifted - lse).astype(out_ref.dtype)


# ---------------------------------------------------------------------------
# Host-side parameter folding / packing
# ---------------------------------------------------------------------------
def _fold_bn(w, b, g, be, m, v):
    """Fold eval-mode BatchNorm1d into a Linear's weight/bias."""
    scale = g * jax.lax.rsqrt(v + BN_EPS)
    return w * scale[None, :], (b - m) * scale + be


def _round_up(a, b):
    return ((a + b - 1) // b) * b


def _pad_cols(a, n):
    p = n - a.shape[-1]
    return a if p == 0 else jnp.pad(a, ((0, 0), (0, p)))


def _pad_rows(a, n):
    p = n - a.shape[0]
    return a if p == 0 else jnp.pad(a, ((0, p), (0, 0)))


def _pad_vec(v, n, value=0.0):
    p = n - v.shape[0]
    return v if p == 0 else jnp.pad(v, (0, p), constant_values=value)


def mc_forward(x, x_general, params, *, tile_m=512):
    N, IN = x.shape
    H = params["w1"].shape[1]
    OUT = params["wo"].shape[1]
    p = params

    Hp = _round_up(H, 128)     # lane-align hidden blocks
    OUTp = _round_up(OUT, 128)  # lane-dense output

    # --- fold BatchNorm into the Linears ---
    w1, b1 = _fold_bn(p["w1"], p["b1"], p["g1"], p["be1"], p["m1"], p["v1"])
    w2, b2 = _fold_bn(p["w2"], p["b2"], p["g2"], p["be2"], p["m2"], p["v2"])
    w3a, b3a = _fold_bn(p["w3"], p["b3"], p["g3"], p["be3"], p["m3"], p["v3"])
    w3b, b3b = _fold_bn(p["w3"], p["b3"], p["g4"], p["be4"], p["m4"], p["v4"])

    # --- pack hidden weights: x-side [w1'|w3a'], xg-side [w2'|w3b'] (no zeros blocks) ---
    wa = jnp.concatenate([_pad_cols(w1, Hp), _pad_cols(w3a, Hp)], axis=1).astype(jnp.bfloat16)
    wb = jnp.concatenate([_pad_cols(w2, Hp), _pad_cols(w3b, Hp)], axis=1).astype(jnp.bfloat16)
    ba = jnp.concatenate([_pad_vec(b1, Hp), _pad_vec(b3a, Hp)]).reshape(1, 2 * Hp)
    bb = jnp.concatenate([_pad_vec(b2, Hp), _pad_vec(b3b, Hp)]).reshape(1, 2 * Hp)

    # --- split + pad output projection ---
    wo = p["wo"]
    wo1 = _pad_cols(_pad_rows(wo[:H], Hp), OUTp).astype(jnp.bfloat16)
    wo2 = _pad_cols(_pad_rows(wo[H:2 * H], Hp), OUTp).astype(jnp.bfloat16)
    wo3 = _pad_cols(_pad_rows(wo[2 * H:], Hp), OUTp).astype(jnp.bfloat16)
    bo = _pad_vec(p["bo"], OUTp, value=-1e30).reshape(1, OUTp)  # f32; pad lanes = -1e30

    # Activations in bf16 for the MXU (callers producing bf16 avoid this cast).
    xb = x.astype(jnp.bfloat16)
    xgb = x_general.astype(jnp.bfloat16)

    # --- row tiling: full batch if it fits a tile, else big 16-aligned tiles ---
    # (single-core v5e/v6e want the biggest tile that fits VMEM; on v7x a
    #  smaller tile_m, e.g. 256, gives each TensorCore several pipeline steps)
    if N <= tile_m:
        tile_m_eff = N
    else:
        tile_m_eff = _round_up(min(tile_m, N), 16)
    grid = (pl.cdiv(N, tile_m_eff),)

    kern = functools.partial(mc_kernel, hp=Hp)
    full = lambda a: pl.BlockSpec(a.shape, lambda i: (0, 0))

    flops = 2 * N * IN * (2 * Hp) * 2 + 2 * N * Hp * OUTp * 3
    bytes_accessed = (
        2 * N * IN * 2                    # x, x_general (bf16)
        + 2 * IN * 2 * Hp * 2             # wa, wb (bf16)
        + 3 * Hp * OUTp * 2               # wo1..3 (bf16)
        + (2 * 2 * Hp + OUTp) * 4         # biases (f32)
        + N * OUTp * 4                    # output (f32)
    )
    ce = pl.CostEstimate(flops=flops, transcendentals=N * OUTp,
                         bytes_accessed=bytes_accessed)

    out_padded = pl.pallas_call(
        kern,
        out_shape=jax.ShapeDtypeStruct((N, OUTp), jnp.float32),
        grid_spec=pltpu.PrefetchScalarGridSpec(
            num_scalar_prefetch=0,
            grid=grid,
            in_specs=[
                pl.BlockSpec((tile_m_eff, IN), lambda i: (i, 0)),  # x
                pl.BlockSpec((tile_m_eff, IN), lambda i: (i, 0)),  # x_general
                full(wa), full(wb), full(ba), full(bb),
                full(wo1), full(wo2), full(wo3), full(bo),
            ],
            out_specs=pl.BlockSpec((tile_m_eff, OUTp), lambda i: (i, 0)),
        ),
        compiler_params=pltpu.CompilerParams(
            dimension_semantics=("parallel",),
            vmem_limit_bytes=64 * 1024 * 1024,
        ),
        cost_estimate=ce,
    )(xb, xgb, wa, wb, ba, bb, wo1, wo2, wo3, bo)

    return out_padded[:, :OUT]


# ---------------------------------------------------------------------------
# Pure-JAX reference (eval-mode semantics of the PyTorch module)
# ---------------------------------------------------------------------------
def mc_reference(x, x_general, params):
    def linear(a, w, b):
        return a @ w + b

    def bn(h, g, be, m, v):
        return (h - m) / jnp.sqrt(v + BN_EPS) * g + be

    p = params
    h1 = jax.nn.relu(bn(linear(x, p["w1"], p["b1"]), p["g1"], p["be1"], p["m1"], p["v1"]))
    h2 = jax.nn.relu(bn(linear(x_general, p["w2"], p["b2"]), p["g2"], p["be2"], p["m2"], p["v2"]))
    h3a = jax.nn.relu(bn(linear(x, p["w3"], p["b3"]), p["g3"], p["be3"], p["m3"], p["v3"]))
    h3b = jax.nn.relu(bn(linear(x_general, p["w3"], p["b3"]), p["g4"], p["be4"], p["m4"], p["v4"]))
    d = jnp.abs(h3a - h3b)
    h_c = jnp.concatenate([h1, h2, d], axis=-1)
    logits = h_c @ p["wo"] + p["bo"]
    return jax.nn.log_softmax(logits, axis=-1)


def init_params(key, in_channels, hidden_channels, out_channels):
    ks = jax.random.split(key, 16)

    def u(k, shape, scale):
        return jax.random.uniform(k, shape, jnp.float32, -scale, scale)

    s_in = 1.0 / jnp.sqrt(in_channels)
    s_h = 1.0 / jnp.sqrt(3 * hidden_channels)
    H = hidden_channels
    params = {
        "w1": u(ks[0], (in_channels, H), s_in), "b1": u(ks[1], (H,), s_in),
        "w2": u(ks[2], (in_channels, H), s_in), "b2": u(ks[3], (H,), s_in),
        "w3": u(ks[4], (in_channels, H), s_in), "b3": u(ks[5], (H,), s_in),
        "wo": u(ks[6], (3 * H, out_channels), s_h), "bo": u(ks[7], (out_channels,), s_h),
    }
    # BatchNorm1d running stats / affine params (deterministic, non-trivial).
    for idx, i in enumerate(["1", "2", "3", "4"]):
        kk = jax.random.split(ks[8 + idx], 4)
        params["g" + i] = 1.0 + 0.1 * jax.random.normal(kk[0], (H,), jnp.float32)
        params["be" + i] = 0.1 * jax.random.normal(kk[1], (H,), jnp.float32)
        params["m" + i] = 0.1 * jax.random.normal(kk[2], (H,), jnp.float32)
        params["v" + i] = 1.0 + 0.1 * jax.random.uniform(kk[3], (H,), jnp.float32)
    return params


if __name__ == "__main__":
    key = jax.random.PRNGKey(0)
    k_x, k_xg, k_p = jax.random.split(key, 3)

    N, IN, HID, OUT = 8, 32, 32, 16
    x = jax.random.normal(k_x, (N, IN), jnp.float32)
    x_general = jax.random.normal(k_xg, (N, IN), jnp.float32)
    params = init_params(k_p, IN, HID, OUT)

    out = mc_forward(x, x_general, params)
    out = jax.block_until_ready(out)

    ref = mc_reference(x, x_general, params)
    assert out.shape == (N, OUT)
    # bf16 MXU dots -> loosened tolerance vs the f32 reference.
    err = float(jnp.max(jnp.abs(out - ref)))
    assert err < 5e-2, f"mismatch vs JAX reference, max abs err {err}"

    print("KERNEL_OK")
</pallas_src>

<mosaic_0001>
module attributes {stable_mosaic.version = 11 : i64} {
  func.func @mc_kernel(%arg0: i32, %arg1: memref<8x32xbf16, #tpu.memory_space<vmem>>, %arg2: memref<8x32xbf16, #tpu.memory_space<vmem>>, %arg3: memref<32x256xbf16, #tpu.memory_space<vmem>>, %arg4: memref<32x256xbf16, #tpu.memory_space<vmem>>, %arg5: memref<1x256xf32, #tpu.memory_space<vmem>>, %arg6: memref<1x256xf32, #tpu.memory_space<vmem>>, %arg7: memref<128x128xbf16, #tpu.memory_space<vmem>>, %arg8: memref<128x128xbf16, #tpu.memory_space<vmem>>, %arg9: memref<128x128xbf16, #tpu.memory_space<vmem>>, %arg10: memref<1x128xf32, #tpu.memory_space<vmem>>, %arg11: memref<8x128xf32, #tpu.memory_space<vmem>>) attributes {dimension_semantics = [#tpu.dimension_semantics<parallel>], iteration_bounds = array<i64: 1>, scalar_prefetch = 0 : i64, scratch_operands = 0 : i64, tpu.core_type = #tpu.core_type<tc>, window_params = [{transform_indices = @transform_0, window_bounds = array<i64: 8, 32>}, {transform_indices = @transform_1, window_bounds = array<i64: 8, 32>}, {pipeline_mode = #tpu.pipeline_mode<synchronous>, transform_indices = @transform_2, window_bounds = array<i64: 32, 256>}, {pipeline_mode = #tpu.pipeline_mode<synchronous>, transform_indices = @transform_3, window_bounds = array<i64: 32, 256>}, {pipeline_mode = #tpu.pipeline_mode<synchronous>, transform_indices = @transform_4, window_bounds = array<i64: 1, 256>}, {pipeline_mode = #tpu.pipeline_mode<synchronous>, transform_indices = @transform_5, window_bounds = array<i64: 1, 256>}, {pipeline_mode = #tpu.pipeline_mode<synchronous>, transform_indices = @transform_6, window_bounds = array<i64: 128, 128>}, {pipeline_mode = #tpu.pipeline_mode<synchronous>, transform_indices = @transform_7, window_bounds = array<i64: 128, 128>}, {pipeline_mode = #tpu.pipeline_mode<synchronous>, transform_indices = @transform_8, window_bounds = array<i64: 128, 128>}, {pipeline_mode = #tpu.pipeline_mode<synchronous>, transform_indices = @transform_9, window_bounds = array<i64: 1, 128>}, {transform_indices = @transform_10, window_bounds = array<i64: 8, 128>}]} {
    %c0 = arith.constant 0 : index
    %c0_0 = arith.constant 0 : index
    %0 = vector.load %arg1[%c0, %c0_0] : memref<8x32xbf16, #tpu.memory_space<vmem>>, vector<8x32xbf16>
    %c0_1 = arith.constant 0 : index
    %c0_2 = arith.constant 0 : index
    %1 = vector.load %arg3[%c0_1, %c0_2] : memref<32x256xbf16, #tpu.memory_space<vmem>>, vector<32x256xbf16>
    %cst = arith.constant dense<0.000000e+00> : vector<8x256xf32>
    %2 = tpu.matmul %0, %1, %cst {dimension_numbers = #tpu.dot_dimension_numbers<[1], [0], [0], [1], [0, 0, 1, 1], [], []>} : vector<8x32xbf16>, vector<32x256xbf16>, vector<8x256xf32> -> vector<8x256xf32>
    %c0_3 = arith.constant 0 : index
    %c0_4 = arith.constant 0 : index
    %3 = vector.load %arg5[%c0_3, %c0_4] : memref<1x256xf32, #tpu.memory_space<vmem>>, vector<1x256xf32>
    %4 = vector.broadcast %3 : vector<1x256xf32> to vector<8x256xf32>
    %5 = arith.addf %2, %4 : vector<8x256xf32>
    %cst_5 = arith.constant 0.000000e+00 : f32
    %6 = vector.broadcast %cst_5 : f32 to vector<8x256xf32>
    %7 = arith.maximumf %5, %6 : vector<8x256xf32>
    %c0_6 = arith.constant 0 : index
    %c0_7 = arith.constant 0 : index
    %8 = vector.load %arg2[%c0_6, %c0_7] : memref<8x32xbf16, #tpu.memory_space<vmem>>, vector<8x32xbf16>
    %c0_8 = arith.constant 0 : index
    %c0_9 = arith.constant 0 : index
    %9 = vector.load %arg4[%c0_8, %c0_9] : memref<32x256xbf16, #tpu.memory_space<vmem>>, vector<32x256xbf16>
    %cst_10 = arith.constant dense<0.000000e+00> : vector<8x256xf32>
    %10 = tpu.matmul %8, %9, %cst_10 {dimension_numbers = #tpu.dot_dimension_numbers<[1], [0], [0], [1], [0, 0, 1, 1], [], []>} : vector<8x32xbf16>, vector<32x256xbf16>, vector<8x256xf32> -> vector<8x256xf32>
    %c0_11 = arith.constant 0 : index
    %c0_12 = arith.constant 0 : index
    %11 = vector.load %arg6[%c0_11, %c0_12] : memref<1x256xf32, #tpu.memory_space<vmem>>, vector<1x256xf32>
    %12 = vector.broadcast %11 : vector<1x256xf32> to vector<8x256xf32>
    %13 = arith.addf %10, %12 : vector<8x256xf32>
    %cst_13 = arith.constant 0.000000e+00 : f32
    %14 = vector.broadcast %cst_13 : f32 to vector<8x256xf32>
    %15 = arith.maximumf %13, %14 : vector<8x256xf32>
    %16 = vector.extract_strided_slice %7 {offsets = [0, 0], sizes = [8, 128], strides = [1, 1]} : vector<8x256xf32> to vector<8x128xf32>
    %17 = vector.extract_strided_slice %15 {offsets = [0, 0], sizes = [8, 128], strides = [1, 1]} : vector<8x256xf32> to vector<8x128xf32>
    %18 = vector.extract_strided_slice %7 {offsets = [0, 128], sizes = [8, 128], strides = [1, 1]} : vector<8x256xf32> to vector<8x128xf32>
    %19 = vector.extract_strided_slice %15 {offsets = [0, 128], sizes = [8, 128], strides = [1, 1]} : vector<8x256xf32> to vector<8x128xf32>
    %20 = arith.subf %18, %19 : vector<8x128xf32>
    %21 = math.absf %20 : vector<8x128xf32>
    %22 = arith.truncf %16 : vector<8x128xf32> to vector<8x128xbf16>
    %c0_14 = arith.constant 0 : index
    %c0_15 = arith.constant 0 : index
    %23 = vector.load %arg7[%c0_14, %c0_15] : memref<128x128xbf16, #tpu.memory_space<vmem>>, vector<128x128xbf16>
    %cst_16 = arith.constant dense<0.000000e+00> : vector<8x128xf32>
    %24 = tpu.matmul %22, %23, %cst_16 {dimension_numbers = #tpu.dot_dimension_numbers<[1], [0], [0], [1], [0, 0, 1, 1], [], []>} : vector<8x128xbf16>, vector<128x128xbf16>, vector<8x128xf32> -> vector<8x128xf32>
    %25 = arith.truncf %17 : vector<8x128xf32> to vector<8x128xbf16>
    %c0_17 = arith.constant 0 : index
    %c0_18 = arith.constant 0 : index
    %26 = vector.load %arg8[%c0_17, %c0_18] : memref<128x128xbf16, #tpu.memory_space<vmem>>, vector<128x128xbf16>
    %cst_19 = arith.constant dense<0.000000e+00> : vector<8x128xf32>
    %27 = tpu.matmul %25, %26, %cst_19 {dimension_numbers = #tpu.dot_dimension_numbers<[1], [0], [0], [1], [0, 0, 1, 1], [], []>} : vector<8x128xbf16>, vector<128x128xbf16>, vector<8x128xf32> -> vector<8x128xf32>
    %28 = arith.addf %24, %27 : vector<8x128xf32>
    %29 = arith.truncf %21 : vector<8x128xf32> to vector<8x128xbf16>
    %c0_20 = arith.constant 0 : index
    %c0_21 = arith.constant 0 : index
    %30 = vector.load %arg9[%c0_20, %c0_21] : memref<128x128xbf16, #tpu.memory_space<vmem>>, vector<128x128xbf16>
    %cst_22 = arith.constant dense<0.000000e+00> : vector<8x128xf32>
    %31 = tpu.matmul %29, %30, %cst_22 {dimension_numbers = #tpu.dot_dimension_numbers<[1], [0], [0], [1], [0, 0, 1, 1], [], []>} : vector<8x128xbf16>, vector<128x128xbf16>, vector<8x128xf32> -> vector<8x128xf32>
    %32 = arith.addf %28, %31 : vector<8x128xf32>
    %c0_23 = arith.constant 0 : index
    %c0_24 = arith.constant 0 : index
    %33 = vector.load %arg10[%c0_23, %c0_24] : memref<1x128xf32, #tpu.memory_space<vmem>>, vector<1x128xf32>
    %34 = vector.broadcast %33 : vector<1x128xf32> to vector<8x128xf32>
    %35 = arith.addf %32, %34 : vector<8x128xf32>
    %cst_25 = arith.constant dense<0xFF800000> : vector<8xf32>
    %36 = vector.multi_reduction <maximumf>, %35, %cst_25 [1] : vector<8x128xf32> to vector<8xf32>
    %37 = vector.shape_cast %36 : vector<8xf32> to vector<8x1xf32>
    %38 = vector.broadcast %37 : vector<8x1xf32> to vector<8x128xf32>
    %39 = arith.subf %35, %38 : vector<8x128xf32>
    %40 = math.exp %39 : vector<8x128xf32>
    %cst_26 = arith.constant dense<0.000000e+00> : vector<8xf32>
    %41 = vector.multi_reduction <add>, %40, %cst_26 [1] : vector<8x128xf32> to vector<8xf32>
    %42 = vector.shape_cast %41 : vector<8xf32> to vector<8x1xf32>
    %43 = math.log %42 : vector<8x1xf32>
    %44 = vector.broadcast %43 : vector<8x1xf32> to vector<8x128xf32>
    %45 = arith.subf %39, %44 : vector<8x128xf32>
    %c0_27 = arith.constant 0 : index
    %c0_28 = arith.constant 0 : index
    %46 = vector.load %arg11[%c0_27, %c0_28] : memref<8x128xf32, #tpu.memory_space<vmem>>, vector<8x128xf32>
    tpu.vector_store %arg11[%c0_27, %c0_28], %45 {strides = array<i32>} : memref<8x128xf32, #tpu.memory_space<vmem>>, vector<8x128xf32>,
    return
  }
  func.func @transform_0(%arg0: i32) -> (i32, i32) {
    %c0_i32 = arith.constant 0 : i32
    %c0_i32_0 = arith.constant 0 : i32
    return %arg0, %c0_i32 : i32, i32
  }
  func.func @transform_1(%arg0: i32) -> (i32, i32) {
    %c0_i32 = arith.constant 0 : i32
    %c0_i32_0 = arith.constant 0 : i32
    return %arg0, %c0_i32 : i32, i32
  }
  func.func @transform_2(%arg0: i32) -> (i32, i32) {
    %c0_i32 = arith.constant 0 : i32
    %c0_i32_0 = arith.constant 0 : i32
    %c0_i32_1 = arith.constant 0 : i32
    return %c0_i32, %c0_i32_0 : i32, i32
  }
  func.func @transform_3(%arg0: i32) -> (i32, i32) {
    %c0_i32 = arith.constant 0 : i32
    %c0_i32_0 = arith.constant 0 : i32
    %c0_i32_1 = arith.constant 0 : i32
    return %c0_i32, %c0_i32_0 : i32, i32
  }
  func.func @transform_4(%arg0: i32) -> (i32, i32) {
    %c0_i32 = arith.constant 0 : i32
    %c0_i32_0 = arith.constant 0 : i32
    %c0_i32_1 = arith.constant 0 : i32
    return %c0_i32, %c0_i32_0 : i32, i32
  }
  func.func @transform_5(%arg0: i32) -> (i32, i32) {
    %c0_i32 = arith.constant 0 : i32
    %c0_i32_0 = arith.constant 0 : i32
    %c0_i32_1 = arith.constant 0 : i32
    return %c0_i32, %c0_i32_0 : i32, i32
  }
  func.func @transform_6(%arg0: i32) -> (i32, i32) {
    %c0_i32 = arith.constant 0 : i32
    %c0_i32_0 = arith.constant 0 : i32
    %c0_i32_1 = arith.constant 0 : i32
    return %c0_i32, %c0_i32_0 : i32, i32
  }
  func.func @transform_7(%arg0: i32) -> (i32, i32) {
    %c0_i32 = arith.constant 0 : i32
    %c0_i32_0 = arith.constant 0 : i32
    %c0_i32_1 = arith.constant 0 : i32
    return %c0_i32, %c0_i32_0 : i32, i32
  }
  func.func @transform_8(%arg0: i32) -> (i32, i32) {
    %c0_i32 = arith.constant 0 : i32
    %c0_i32_0 = arith.constant 0 : i32
    %c0_i32_1 = arith.constant 0 : i32
    return %c0_i32, %c0_i32_0 : i32, i32
  }
  func.func @transform_9(%arg0: i32) -> (i32, i32) {
    %c0_i32 = arith.constant 0 : i32
    %c0_i32_0 = arith.constant 0 : i32
    %c0_i32_1 = arith.constant 0 : i32
    return %c0_i32, %c0_i32_0 : i32, i32
  }
  func.func @transform_10(%arg0: i32) -> (i32, i32) {
    %c0_i32 = arith.constant 0 : i32
    %c0_i32_0 = arith.constant 0 : i32
    return %arg0, %c0_i32 : i32, i32
  }
}

</mosaic_0001>

<bundles_post_ra>
// kernel: tpu_custom_call.1
= control target key start
LH: loop header
LB: loop body
LE: loop exit
PB: predicated region body
PF: predicated region fallthrough
CT: control target
= control target key end

     0   :  { %15 = vsyncpa [#allocation3], 0  ;;  %s1027_s0 = inlined_call_operand.hbm [shape: bf16[8,32], index: 0, kind: input, shape index: {}]   ;;  %s1028_s1 = inlined_call_operand.hbm [shape: bf16[8,32], index: 1, kind: input, shape index: {}]   ;;  %s1029_s2 = inlined_call_operand.hbm [shape: bf16[32,256], index: 2, kind: input, shape index: {}]   ;;  %s1030_s3 = inlined_call_operand.hbm [shape: bf16[32,256], index: 3, kind: input, shape index: {}]   ;;  %s1031_s4 = inlined_call_operand.vmem [shape: f32[1,256], index: 4, kind: input, shape index: {}]   ;;  %s1032_s5 = inlined_call_operand.vmem [shape: f32[1,256], index: 5, kind: input, shape index: {}]   ;;  %s1033_s6 = inlined_call_operand.hbm [shape: bf16[128,128], index: 6, kind: input, shape index: {}]   ;;  %s1034_s7 = inlined_call_operand.hbm [shape: bf16[128,128], index: 7, kind: input, shape index: {}]   ;;  %s1035_s8 = inlined_call_operand.hbm [shape: bf16[128,128], index: 8, kind: input, shape index: {}]   ;;  %s1036_s9 = inlined_call_operand.vmem [shape: f32[1,128], index: 9, kind: input, shape index: {}]   ;;  %s1037_s10 = inlined_call_operand.hbm [shape: f32[8,128], index: 10, kind: output, shape index: {}]  }
   0x1   :  { %16 = vsyncpa [#allocation6], 0 }
   0x2   :  { %17 = vsyncpa [#allocation9], 0 }
   0x3   :  { %18 = vsyncpa [#allocation12], 0  ;;  %s36_s15 = sshll.u32 %s1028_s1, 4  ;;  %s37_s15 = int_to_ptr.hbm [resolvable:$true] %s36_s15 }
   0x4   :  { %19 = vsyncpa [#allocation4], 0  ;;  %s923_s16 = smov [#allocation5]   ;;  %s59_s20 = sshll.u32 %s1030_s3, 4  ;;  %s60_s20 = int_to_ptr.hbm [resolvable:$true] %s59_s20 }
   0x5   :  { %s38_s17 = sshll.u32 %s923_s16, 4  ;;  %s924_s21 = smov [#allocation8]   ;;  %s39_s17 = int_to_ptr.vmem [resolvable:$true] %s38_s17 }
   0x6   :  { %41 = dma.hbm_to_vmem [thread:$0]  %s37_s15, 64, %s39_s17, [#allocation6]  }
   0x7   :  { %s61_s22 = sshll.u32 %s924_s21, 4  ;;  %s925_s23 = smov 128   ;;  %s62_s22 = int_to_ptr.vmem [resolvable:$true] %s61_s22 }
   0x8   :  { %s926_s24 = smov 8   ;;  %s89_s1 = sshll.u32 %s1034_s7, 4  ;;  %s90_s1 = int_to_ptr.hbm [resolvable:$true] %s89_s1 }
   0x9   :  { %67 = dma.hbm_to_vmem [thread:$0]  %s60_s20, 512, %s62_s22, [#allocation9], %s925_s23, %s925_s23, %s926_s24  }
   0xa   :  { %s927_s27 = smov [#allocation11]   ;;  %s25_s11 = sshll.u32 %s1027_s0, 4  ;;  %s26_s11 = int_to_ptr.hbm [resolvable:$true] %s25_s11 }
   0xb   :  { %s91_s28 = sshll.u32 %s927_s27, 4  ;;  %s928_s3 = smov 64   ;;  %s92_s28 = int_to_ptr.vmem [resolvable:$true] %s91_s28 }
   0xc   :  { %s929_s12 = smov 4   ;;  %s930_s13 = smov [#allocation2]  }
   0xd   :  { %97 = dma.hbm_to_vmem [thread:$0]  %s90_s1, 1024, %s92_s28, [#allocation12], %s928_s3, %s928_s3, %s929_s12  }
   0xe   :  { %s27_s14 = sshll.u32 %s930_s13, 4  ;;  %s46_s17 = sshll.u32 %s1029_s2, 4  ;;  %s28_s14 = int_to_ptr.vmem [resolvable:$true] %s27_s14  ;;  %s47_s17 = int_to_ptr.hbm [resolvable:$true] %s46_s17 }
   0xf   :  { %30 = dma.hbm_to_vmem [thread:$0]  %s26_s11, 64, %s28_s14, [#allocation3]  }
  0x10   :  { %s76_s19 = sshll.u32 %s1033_s6, 4  ;;  %s931_s20 = smov [#allocation7]   ;;  %s77_s19 = int_to_ptr.hbm [resolvable:$true] %s76_s19 }
  0x11   :  { %s48_s21 = sshll.u32 %s931_s20, 4  ;;  %s932_s0 = smov [#allocation10]   ;;  %s49_s21 = int_to_ptr.vmem [resolvable:$true] %s48_s21 }
  0x12   :  { %54 = dma.hbm_to_vmem [thread:$0]  %s47_s17, 512, %s49_s21, [#allocation6], %s925_s23, %s925_s23, %s926_s24  }
  0x13   :  { %s78_s22 = sshll.u32 %s932_s0, 4  ;;  %s102_s1 = sshll.u32 %s1035_s8, 4  ;;  %s79_s22 = int_to_ptr.vmem [resolvable:$true] %s78_s22  ;;  %s103_s1 = int_to_ptr.hbm [resolvable:$true] %s102_s1 }
  0x14   :  { %84 = dma.hbm_to_vmem [thread:$0]  %s77_s19, 1024, %s79_s22, [#allocation9], %s928_s3, %s928_s3, %s929_s12  }
  0x15   :  { %s933_s2 = smov [#allocation13]  }
  0x16   :  { %s104_s27 = sshll.u32 %s933_s2, 4  ;;  %s105_s27 = int_to_ptr.vmem [resolvable:$true] %s104_s27 }
  0x17   :  { %110 = dma.hbm_to_vmem [thread:$0]  %s103_s1, 1024, %s105_s27, [#allocation12], %s928_s3, %s928_s3, %s929_s12  }
  0x18   :  { %913 = dma.done.wait [#allocation3], 64  }
  0x19   :  { %914 = vsyncadd [#allocation3], 4294967232 }
  0x1a   :  { %915 = dma.done.wait [#allocation6], 576  }
  0x1b   :  { %916 = vsyncadd [#allocation6], 4294966720 }
  0x1c   :  { %917 = dma.done.wait [#allocation9], 1536  }
  0x1d   :  { %918 = vsyncadd [#allocation9], 4294965760 }
  0x1e   :  { %919 = dma.done.wait [#allocation12], 2048  }
  0x1f   :  { %920 = vsyncadd [#allocation12], 4294965248  ;;  %v550_v0 = vld [vmem:[#allocation7 + $0x10] sm:$0xf]  ;;  %v675_v1 = vld [vmem:[#allocation7 + $0x14] sm:$0xf0] }
  0x20   :  { %v568_v2 = vld [vmem:[#allocation8 + $0x10] sm:$0xf]  ;;  %v551_v3 = vor.u32 %v675_v1, %v550_v0  ;;  %v679_v4 = vld [vmem:[#allocation8 + $0x14] sm:$0xf0]  ;;  %v542_v5 = vld [vmem:[#allocation7] sm:$0xf] }
  0x21   :  { %v673_v6 = vld [vmem:[#allocation7 + $0x4] sm:$0xf0]  ;;  %v569_v7 = vor.u32 %v679_v4, %v568_v2  ;;  %v560_v8 = vld [vmem:[#allocation8] sm:$0xf]  ;;  %v678_v11 = vld [vmem:[#allocation8 + $0x14] sm:$0xf] }
  0x22   :  { %v677_v9 = vld [vmem:[#allocation8 + $0x4] sm:$0xf0]  ;;  %183 = vmatpush.bf16.msra.mxu3 %v551_v3  ;;  %v543_v10 = vor.u32 %v673_v6, %v542_v5  ;;  %v570_v12 = vld [vmem:[#allocation8 + $0x18] sm:$0xf0]  ;;  %v674_v15 = vld [vmem:[#allocation7 + $0x14] sm:$0xf] }
  0x23   :  { %245 = vmatpush.bf16.msra.mxu2 %v569_v7  ;;  %v561_v13 = vor.u32 %v677_v9, %v560_v8  ;;  %v573_v14 = vor.u32 %v678_v11, %v570_v12  ;;  %v552_v16 = vld [vmem:[#allocation7 + $0x18] sm:$0xf0]  ;;  %v676_v17 = vld [vmem:[#allocation8 + $0x4] sm:$0xf]  ;;  %v562_v19 = vld [vmem:[#allocation8 + $0x8] sm:$0xf0] }
  0x24   :  { %v555_v18 = vor.u32 %v674_v15, %v552_v16  ;;  %v672_v20 = vld [vmem:[#allocation7 + $0x4] sm:$0xf]  ;;  %v544_v21 = vld [vmem:[#allocation7 + $0x8] sm:$0xf0]  ;;  %v695_v22 = vld [vmem:[#allocation11 + $0x38] sm:$0xff]  ;;  %vm173_vm0 = vcmask 261120   ;;  %v565_v26 = vor.u32 %v676_v17, %v562_v19 }
  0x25   :  { %v142_v23 = vld [vmem:[#allocation2] sm:$0xf]  ;;  %v547_v24 = vor.u32 %v672_v20, %v544_v21  ;;  %v205_v25 = vld [vmem:[#allocation5] sm:$0xf]  ;;  %351 = vmatpush.bf16.msra.mxu0 %v695_v22  ;;  %v694_v28 = vld [vmem:[#allocation11 + $0x30] sm:$0xff]  ;;  %s934_s28 = smov [#allocation14]  }
  0x26   :  { %184 = vmatpush.bf16.msra.mxu3 %v543_v10  ;;  %196 = vmatpush.bf16.msra.mxu1 %v555_v18  ;;  %v687_v27 = vld [vmem:[#allocation10 + $0x38] sm:$0xff]  ;;  %v686_v30 = vld [vmem:[#allocation10 + $0x30] sm:$0xff]  ;;  %v693_v31 = vld [vmem:[#allocation11 + $0x28] sm:$0xff]  ;;  %s525_s29 = sshll.u32 %s934_s28, 4  ;;  %s526_s29 = int_to_ptr.vmem [resolvable:$true] %s525_s29 }
  0x27   :  { %246 = vmatpush.bf16.msra.mxu2 %v561_v13  ;;  %v703_v29 = vld [vmem:[#allocation13 + $0x38] sm:$0xff]  ;;  %v685_v32 = vld [vmem:[#allocation10 + $0x28] sm:$0xff]  ;;  %v692_v33 = vld [vmem:[#allocation11 + $0x20] sm:$0xff] }
  0x28   :  { %v684_v34 = vld [vmem:[#allocation10 + $0x20] sm:$0xff]  ;;  %v691_v35 = vld [vmem:[#allocation11 + $0x18] sm:$0xff]  ;;  %v690_v37 = vld [vmem:[#allocation11 + $0x10] sm:$0xff] }
  0x29   :  { %556 = vmatmul.msk.bf16.vlgmr.msra.gmra.mxu3 %vm173_vm0, %v142_v23  ;;  %352 = vmatpush.bf16.msra.mxu0 %v694_v28  ;;  %v683_v36 = vld [vmem:[#allocation10 + $0x18] sm:$0xff]  ;;  %v682_v38 = vld [vmem:[#allocation10 + $0x10] sm:$0xff]  ;;  %v689_v39 = vld [vmem:[#allocation11 + $0x8] sm:$0xff] }
  0x2a   :  { %258 = vmatpush.bf16.msrb.mxu3 %v573_v14  ;;  %574 = vmatmul.msk.bf16.vlgmr.msra.gmra.mxu2 %vm173_vm0, %v205_v25  ;;  %v681_v40 = vld [vmem:[#allocation10 + $0x8] sm:$0xff]  ;;  %v702_v41 = vld [vmem:[#allocation13 + $0x30] sm:$0xff]  ;;  %v688_v42 = vld [vmem:[#allocation11] sm:$0xff] }
  0x2b   :  { %197 = vmatpush.bf16.msra.mxu1 %v547_v24  ;;  %490 = vmatpush.bf16.msrb.mxu2 %v703_v29  ;;  %v680_v43 = vld [vmem:[#allocation10] sm:$0xff]  ;;  %v701_v44 = vld [vmem:[#allocation13 + $0x28] sm:$0xff]  ;;  %v699_v46 = vld [vmem:[#allocation13 + $0x18] sm:$0xff] }
  0x2c   :  { %v700_v45 = vld [vmem:[#allocation13 + $0x20] sm:$0xff]  ;;  %v698_v47 = vld [vmem:[#allocation13 + $0x10] sm:$0xff]  ;;  %v697_v48 = vld [vmem:[#allocation13 + $0x8] sm:$0xff] }
  0x2d   :  { %353 = vmatpush.bf16.msra.mxu0 %v693_v31  ;;  %v696_v49 = vld [vmem:[#allocation13] sm:$0xff]  ;;  %v147_v50 = vld [vmem:[%s1031_s4] sm:$0x3] }
  0x2e   :  { %259 = vmatpush.bf16.msrb.mxu3 %v565_v26  ;;  %557 = vmatmul.msk.bf16.vlgmr.msra.gmra.mxu1 %vm173_vm0, %v142_v23  ;;  %v210_v51 = vld [vmem:[%s1032_s5] sm:$0x3]  ;;  %v149_v52 = vperm.slane %v147_v50, 0  ;;  %v150_v1 = vperm.slane %v147_v50, 1 }
  0x2f   :  { %412 = vmatpush.bf16.msrb.mxu1 %v687_v27  ;;  %491 = vmatpush.bf16.msrb.mxu2 %v702_v41  ;;  %v212_v53 = vperm.slane %v210_v51, 0  ;;  %v213_v4 = vperm.slane %v210_v51, 1  ;;  %v716_v18 = vld [vmem:[%s1036_s9] ss:$0 sm:$0xff]  ;;  %s527_s9 = sshll.u32 %s1037_s10, 4  ;;  %s528_s9 = int_to_ptr.hbm [resolvable:$true] %s527_s9 }
  0x31   :  { %354 = vmatpush.bf16.msra.mxu0 %v692_v33 }
  0x33   :  { %413 = vmatpush.bf16.msrb.mxu1 %v686_v30  ;;  %492 = vmatpush.bf16.msrb.mxu2 %v701_v44 }
  0x35   :  { %355 = vmatpush.bf16.msra.mxu0 %v691_v35 }
  0x37   :  { %414 = vmatpush.bf16.msrb.mxu1 %v685_v32  ;;  %493 = vmatpush.bf16.msrb.mxu2 %v700_v45 }
  0x39   :  { %575 = vmatmul.msk.bf16.vlgmr.msrb.gmra.mxu3 %vm173_vm0, %v205_v25  ;;  %356 = vmatpush.bf16.msra.mxu0 %v690_v37 }
  0x3b   :  { %415 = vmatpush.bf16.msrb.mxu1 %v684_v34  ;;  %494 = vmatpush.bf16.msrb.mxu2 %v699_v46 }
  0x3d   :  { %357 = vmatpush.bf16.msra.mxu0 %v689_v39 }
  0x3f   :  { %416 = vmatpush.bf16.msrb.mxu1 %v683_v36  ;;  %495 = vmatpush.bf16.msrb.mxu2 %v698_v47 }
  0x41   :  { %358 = vmatpush.bf16.msra.mxu0 %v688_v42 }
  0x43   :  { %417 = vmatpush.bf16.msrb.mxu1 %v682_v38  ;;  %496 = vmatpush.bf16.msrb.mxu2 %v697_v48 }
  0x47   :  { %418 = vmatpush.bf16.msrb.mxu1 %v681_v40  ;;  %497 = vmatpush.bf16.msrb.mxu2 %v696_v49 }
  0x4b   :  { %419 = vmatpush.bf16.msrb.mxu1 %v680_v43 }
  0xab   :  { %v199_v54 = vpop.f32.mrf.mxu1 }
  0xac   :  { %v186_v55 = vpop.f32.mrf.mxu3  ;;  %v200_v3 = vadd.f32 %v199_v54, %v150_v1 }
  0xad   :  { %v187_v56 = vadd.f32 %v186_v55, %v149_v52  ;;  %v248_v57 = vpop.f32.mrf.mxu2 }
  0xae   :  { %v249_v58 = vadd.f32 %v248_v57, %v212_v53  ;;  %v204_v6 = vmax.f32 %v200_v3, 0.0 }
  0xaf   :  { %v203_v59 = vmax.f32 %v187_v56, 0.0 }
  0xb0   :  { %v265_v60 = vmax.f32 %v249_v58, 0.0 }
  0xb1   :  { %v269_v61 = vpack.c.bf16 %v203_v59, %v203_v59 }
  0xb2   :  { %v286_v62 = vpack.c.bf16 %v265_v60, %v265_v60 }
  0xb3   :  { %v201_v63 = vpop.f32.mrf.mxu1  ;;  %420 = vmatmul.bf16.vlgmr.msrb.gmra.mxu1 %v269_v61 }
  0xb4   :  { %359 = vmatmul.bf16.vlgmr.msra.gmra.mxu0 %v286_v62  ;;  %v188_v0 = vpop.f32.mrf.mxu3 }
  0xb5   :  { %v250_v2 = vpop.f32.mrf.mxu2 }
  0xbc   :  { %v261_v5 = vpop.f32.mrf.mxu3 }
  0xbd   :  { %v262_v7 = vadd.f32 %v261_v5, %v213_v4 }
  0xbf   :  { %v266_v8 = vmax.f32 %v262_v7, 0.0 }
  0xc1   :  { %v267_v9 = vsub.f32 %v204_v6, %v266_v8 }
  0xc3   :  { %v268_v10 = vand.u32 2147483647, %v267_v9 }
  0xc4   :  { %v263_v11 = vpop.f32.mrf.mxu3 }
  0xc5   :  { %v425_v12 = vpack.c.bf16 %v268_v10, %v268_v10 }
  0xc7   :  { %498 = vmatmul.bf16.vlgmr.msrb.gmra.mxu2 %v425_v12 }
 0x130   :  { %v421_v13 = vpop.f32.mrf.mxu1 }
 0x131   :  { %v360_v14 = vpop.f32.mrf.mxu0 }
 0x132   :  { %v422_v17 = vadd.f32 %v421_v13, %v360_v14 }
 0x138   :  { %v423_v15 = vpop.f32.mrf.mxu1 }
 0x139   :  { %v362_v16 = vpop.f32.mrf.mxu0 }
 0x14a   :  { %v499_v19 = vpop.f32.mrf.mxu2 }
 0x14b   :  { %v503_v20 = vadd.f32 %v499_v19, %v422_v17 }
 0x14d   :  { %v508_v21 = vadd.f32 %v716_v18, %v503_v20 }
 0x14f   :  { %509 = vmax.xlane.f32.xlu0 %v508_v21 }
 0x152   :  { %v501_v22 = vpop.f32.mrf.mxu2 }
 0x1c2   :  { %v510_v23 = vpop.xlane.xlu0 %509 }
 0x1c3   :  { %v511_v24 = vsub.f32 %v508_v21, %v510_v23 }
 0x1c5   :  { %v512_v25 = vmul.f32 1.442695, %v511_v24 }
 0x1c7   :  { %717 = vpow2.f32 %v512_v25 }
 0x1cd   :  { %v718_v26 = vpop.eup %717 }
 0x1ce   :  { %514 = vadd.xlane.f32.xlu0 %v718_v26 }
 0x241   :  { %v515_v27 = vpop.xlane.xlu0 %514 }
 0x242   :  { %719 = vlog2.f32 %v515_v27 }
 0x248   :  { %v720_v28 = vpop.eup %719 }
 0x249   :  { %v517_v29 = vmul.f32 0.6931472, %v720_v28 }
 0x24b   :  { %v518_v30 = vsub.f32 %v511_v24, %v517_v29 }
 0x24d   :  { %519 = vst [vmem:[#allocation14] sm:$0xff] %v518_v30 }
 0x24e   :  { %530 = dma.vmem_to_hbm [thread:$0]  %s526_s29, 128, %s528_s9, [#allocation4]  }
 0x24f   :  { %921 = dma.done.wait [#allocation4], 128  }
 0x250   :  { %922 = vsyncadd [#allocation4], 4294967168 }
 0x251   :  { %535 = vsyncpa [#allocation3], 1 }
 0x252   :  { %536 = vsyncpa [#allocation6], 1 }
 0x253   :  { %537 = vsyncpa [#allocation9], 1 }
 0x254   :  { %538 = vsyncpa [#allocation12], 1 }
 0x255   :  { %539 = vsyncpa [#allocation4], 1 }

</bundles_post_ra>
